<compile_context>
chip_gen: v6e
topology: v6e:2x2x1
jax: 0.10.0
libtpu: 0.0.40
codegen_flags: <defaults>
</compile_context>

<pallas_src>
import jax
import jax.numpy as jnp
from jax.experimental import pallas as pl
from jax.experimental.pallas import tpu as pltpu


# ---------------------------------------------------------------------------
# Kernels
# ---------------------------------------------------------------------------

def _identity_touch_kernel(x_ref, o_ref):
    # Output buffer is aliased to the input buffer: nothing to compute and
    # nothing to DMA. Touch the output so the dependency is not dropped.
    del x_ref
    pltpu.touch(o_ref)


def _identity_copy_kernel(x_ref, o_ref):
    # Straight VMEM tile copy (pure pass-through).
    o_ref[...] = x_ref[...]


# ---------------------------------------------------------------------------
# Zero-copy (no-DMA) path
# ---------------------------------------------------------------------------

def _identity_alias(x):
    return pl.pallas_call(
        _identity_touch_kernel,
        out_shape=jax.ShapeDtypeStruct(x.shape, x.dtype),
        in_specs=[pl.BlockSpec(memory_space=pl.ANY)],
        out_specs=pl.BlockSpec(memory_space=pl.ANY),
        input_output_aliases={0: 0},
    )(x)


_ALIAS_PATH_OK = None  # lazily probed once; cached for all later calls


def identity(x):
    """Pallas identity: returns x unchanged (same shape, same dtype).

    For true in-place behavior (no hidden defensive copy), call under
    jax.jit(identity, donate_argnums=0) or otherwise donate x.
    """
    global _ALIAS_PATH_OK
    if x.size == 0:
        return x

    if _ALIAS_PATH_OK is None:
        # Probe the no-DMA aliased path once; fall back to the copy kernel if
        # this jax/Mosaic version rejects the no-op lowering.
        try:
            y = _identity_alias(x)
            jax.block_until_ready(y)
            _ALIAS_PATH_OK = True
            return y
        except Exception:
            _ALIAS_PATH_OK = False

    if _ALIAS_PATH_OK:
        return _identity_alias(x)
    return identity_copy(x)


# ---------------------------------------------------------------------------
# Materializing copy path (fallback / non-aliasing variant)
# ---------------------------------------------------------------------------

_MAX_LANE_WIDTH = 8192   # widen lanes up to 8192 for fat, unmasked vst
_COPY_PARAMS_CACHE = None


def _sublane_min(dtype) -> int:
    # Minimum second-to-last tile dim: f32 -> 8, bf16 -> 16, int8/fp8 -> 32.
    return {4: 8, 2: 16, 1: 32}.get(jnp.dtype(dtype).itemsize, 8)


def _tpu_copy_params():
    """Generation-aware (block_bytes, vmem_limit_bytes, small_bytes)."""
    global _COPY_PARAMS_CACHE
    if _COPY_PARAMS_CACHE is not None:
        return _COPY_PARAMS_CACHE

    vmem_cap = None
    try:
        vmem_cap = getattr(pltpu.get_tpu_info(), "vmem_capacity_bytes", None)
    except Exception:
        vmem_cap = None

    if vmem_cap is None or vmem_cap <= (64 << 20):
        # v7x-class (64 MiB VMEM per TC, ~3.2 TB/s HBM) or unknown: stay
        # conservative on VMEM, and route mid-size tensors through the grid so
        # both TensorCores can issue DMAs concurrently.
        block_bytes = 4 << 20
        vmem_limit = 24 << 20     # ~4x block (in+out, double-buffered) + margin
        small_bytes = 1 << 20
    else:
        # v5e / v6e: 128 MiB VMEM, single TensorCore.
        block_bytes = 8 << 20
        vmem_limit = 48 << 20
        small_bytes = 2 << 20

    _COPY_PARAMS_CACHE = (block_bytes, vmem_limit, small_bytes)
    return _COPY_PARAMS_CACHE


def _widen_lanes(total):
    # total % 128 == 0 guaranteed by caller. Widen the lane dim (a free,
    # contiguous reshape) for fat, unmasked vector loads/stores.
    cols = 128
    while cols * 2 <= _MAX_LANE_WIDTH and total % (cols * 2) == 0:
        cols *= 2
    return cols


def identity_copy(x):
    """Materializing Pallas copy of x (used when the no-DMA path is unavailable
    or when an explicit fresh buffer is wanted)."""
    orig_shape = x.shape
    dtype = x.dtype
    total = x.size
    if total == 0:
        return x

    itemsize = jnp.dtype(dtype).itemsize
    nbytes = total * itemsize
    block_bytes, vmem_limit, small_bytes = _tpu_copy_params()
    sub = _sublane_min(dtype)

    # ---- Path A: whole array in one VMEM block, lane-densified. ----
    if nbytes <= small_bytes:
        if total % 128 == 0:
            cols = _widen_lanes(total)
            rows = total // cols
            y2d = pl.pallas_call(
                _identity_copy_kernel,
                out_shape=jax.ShapeDtypeStruct((rows, cols), dtype),
            )(x.reshape(rows, cols))
            return y2d.reshape(orig_shape)
        # Genuinely odd element count: single full-array block as-is.
        return pl.pallas_call(
            _identity_copy_kernel,
            out_shape=jax.ShapeDtypeStruct(orig_shape, dtype),
        )(x)

    # ---- Path B: tiled lane-dense copy, cdiv grid, ragged last block. ----
    if total % 128 == 0:
        cols = _widen_lanes(total)
    elif x.ndim >= 2 and (total // orig_shape[-1]) >= sub:
        # Keep the original last dim (block last dim == full dim is legal).
        # TODO(synk): for v5e, a 128-aligned main chunk + tiny tail copy would
        # avoid masked partial stores here; accepted only for truly odd shapes.
        cols = orig_shape[-1]
    else:
        # Rare degenerate case (large odd-length 1-D input): single row.
        cols = total
    rows = total // cols
    x2d = x.reshape(rows, cols)

    if rows >= sub:
        tile_rows = max(sub, (block_bytes // (cols * itemsize)) // sub * sub)
        tile_rows = min(tile_rows, rows // sub * sub)
    else:
        tile_rows = rows  # block == full array along rows (legal)

    out2d = pl.pallas_call(
        _identity_copy_kernel,
        out_shape=jax.ShapeDtypeStruct((rows, cols), dtype),
        grid=(pl.cdiv(rows, tile_rows),),
        in_specs=[pl.BlockSpec((tile_rows, cols), lambda i: (i, 0))],
        out_specs=pl.BlockSpec((tile_rows, cols), lambda i: (i, 0)),
        compiler_params=pltpu.CompilerParams(
            dimension_semantics=("parallel",),
            vmem_limit_bytes=vmem_limit,
        ),
    )(x2d)
    return out2d.reshape(orig_shape)


# ---------------------------------------------------------------------------
# Smoke test
# ---------------------------------------------------------------------------

if __name__ == "__main__":
    key = jax.random.PRNGKey(0)

    # NCHW input matching the module's use in resnet: batch=2, channels=4, 16x16.
    x = jax.random.normal(key, (2, 4, 16, 16), dtype=jnp.float32)

    # Primary (no-DMA, aliased) path.
    y = identity(x)
    jax.block_until_ready(y)
    assert y.shape == x.shape
    assert y.dtype == x.dtype
    assert bool(jnp.all(y == x))

    # Materializing copy, Path A (lane-dense single block).
    y_a = identity_copy(x)
    jax.block_until_ready(y_a)
    assert y_a.shape == x.shape
    assert y_a.dtype == x.dtype
    assert bool(jnp.all(y_a == x))

    # Materializing copy, Path B (tiled lane-dense grid, ~3 MiB tensor).
    x2 = jax.random.normal(jax.random.PRNGKey(1), (16, 16, 56, 56), dtype=jnp.float32)
    y_b = identity_copy(x2)
    jax.block_until_ready(y_b)
    assert y_b.shape == x2.shape
    assert y_b.dtype == x2.dtype
    assert bool(jnp.all(y_b == x2))

    print("KERNEL_OK")
</pallas_src>

<mosaic_0001>
module attributes {stable_mosaic.version = 11 : i64} {
  func.func @_identity_touch_kernel(%arg0: memref<2x4x16x16xf32, #tpu.memory_space<any>>, %arg1: memref<2x4x16x16xf32, #tpu.memory_space<any>>) attributes {dimension_semantics = [], scalar_prefetch = 0 : i64, scratch_operands = 0 : i64, tpu.core_type = #tpu.core_type<tc>} {
    return
  }
}

module attributes {stable_mosaic.version = 11 : i64} {
  func.func @_identity_copy_kernel(%arg0: memref<1x2048xf32, #tpu.memory_space<vmem>>, %arg1: memref<1x2048xf32, #tpu.memory_space<vmem>>) attributes {dimension_semantics = [], scalar_prefetch = 0 : i64, scratch_operands = 0 : i64, tpu.core_type = #tpu.core_type<tc>} {
    %c0 = arith.constant 0 : index
    %c0_0 = arith.constant 0 : index
    %0 = vector.load %arg0[%c0, %c0_0] : memref<1x2048xf32, #tpu.memory_space<vmem>>, vector<1x2048xf32>
    %c0_1 = arith.constant 0 : index
    %c0_2 = arith.constant 0 : index
    %1 = vector.load %arg1[%c0_1, %c0_2] : memref<1x2048xf32, #tpu.memory_space<vmem>>, vector<1x2048xf32>
    tpu.vector_store %arg1[%c0_1, %c0_2], %0 {strides = array<i32>} : memref<1x2048xf32, #tpu.memory_space<vmem>>, vector<1x2048xf32>,
    return
  }
}

</mosaic_0001>

<bundles_post_ra>
// kernel: tpu_custom_call.1
= control target key start
LH: loop header
LB: loop body
LE: loop exit
PB: predicated region body
PF: predicated region fallthrough
CT: control target
= control target key end

     0   :  { %s16_s0 = inlined_call_operand.hbm [shape: f32[2,4,16,16], index: 0, kind: input, shape index: {}, may-alias: {0,1}]   ;;  %s17_s1 = inlined_call_operand.hbm [shape: f32[2,4,16,16], index: 1, kind: output, shape index: {}, may-alias: {0,1}]  }

// kernel: tpu_custom_call.1
= control target key start
LH: loop header
LB: loop body
LE: loop exit
PB: predicated region body
PF: predicated region fallthrough
CT: control target
= control target key end

     0   :  { %6 = vsyncpa [#allocation3], 0  ;;  %s104_s0 = inlined_call_operand.hbm [shape: f32[1,2048], index: 0, kind: input, shape index: {}]   ;;  %s105_s1 = inlined_call_operand.hbm [shape: f32[1,2048], index: 1, kind: output, shape index: {}]  }
   0x1   :  { %7 = vsyncpa [#allocation4], 0  ;;  %s86_s6 = smov [#allocation2]  }
   0x2   :  { %s14_s7 = sshll.u32 %s86_s6, 4  ;;  %s15_s7 = int_to_ptr.vmem [resolvable:$true] %s14_s7 }
   0x3   :  { %s50_s8 = scalar_lea.vmem %s15_s7, 256  ;;  %p55_p1 = scmp.lt.s32.totalorder %s15_s7, %s15_s7 }
   0x4   :  { %p51_p0 = scmp.ne.s32.totalorder %s15_s7, %s50_s8  ;;  %p56_p2 = scmp.lt.s32.totalorder %s50_s8, %s50_s8 }
   0x6   :  { %p57_p3 = por %p56_p2, %p55_p1 }
   0x8   :  { %p58_p4 = pnand %p57_p3, %p51_p0 }
   0xa   :  { %61 = shalt.err (!%p58_p4)
}
   0xb   :  { %17 = dma.hbm_to_vmem [thread:$0]  %s104_s0, 256, %s15_s7, [#allocation3]  }
   0xc   :  { %82 = dma.done.wait [#allocation3], 256  }
   0xd   :  { %83 = vsyncadd [#allocation3], 4294967040  ;;  %s87_s11 = smov [#allocation5]   ;;  %v21_v0 = vld [vmem:[#allocation2] sm:$0xff]  ;;  %v22_v1 = vld [vmem:[#allocation2 + $0x8] sm:$0xff] }
   0xe   :  { %s31_s12 = sshll.u32 %s87_s11, 4  ;;  %23 = vst [vmem:[#allocation5] sm:$0xff] %v21_v0  ;;  %24 = vst [vmem:[#allocation5 + $0x8] sm:$0xff] %v22_v1  ;;  %s32_s12 = int_to_ptr.vmem [resolvable:$true] %s31_s12 }
   0xf   :  { %s62_s13 = scalar_lea.vmem %s32_s12, 256  ;;  %p67_p6 = scmp.lt.s32.totalorder %s32_s12, %s32_s12 }
  0x10   :  { %p63_p5 = scmp.ne.s32.totalorder %s32_s12, %s62_s13  ;;  %p68_p7 = scmp.lt.s32.totalorder %s62_s13, %s62_s13 }
  0x12   :  { %p69_p8 = por %p68_p7, %p67_p6 }
  0x14   :  { %p70_p9 = pnand %p69_p8, %p63_p5 }
  0x16   :  { %73 = shalt.err (!%p70_p9)
}
  0x17   :  { %34 = dma.vmem_to_hbm [thread:$0]  %s32_s12, 256, %s105_s1, [#allocation4]  }
  0x18   :  { %84 = dma.done.wait [#allocation4], 256  }
  0x19   :  { %85 = vsyncadd [#allocation4], 4294967040 }
  0x1a   :  { %38 = vsyncpa [#allocation3], 1 }
  0x1b   :  { %39 = vsyncpa [#allocation4], 1 }

</bundles_post_ra>
